<compile_context>
chip_gen: v5e
topology: v5e:2x2
jax: 0.10.0
libtpu: 0.0.40
codegen_flags: <defaults>
</compile_context>

<pallas_src>
import functools

import jax
import jax.numpy as jnp
from jax.experimental import pallas as pl
from jax.experimental.pallas import tpu as pltpu


def _round_up(x, m):
    return ((x + m - 1) // m) * m


def _prediction_kernel(x_ref, w_ref, b_ref, out_ref):
    # One lane-dense MXU matmul for both heads: (TB, D) @ (D, P_pad) + (1, P_pad).
    # Bias add is a VPU op and co-issues under the matmul's slot budget.
    out_ref[...] = (
        jnp.dot(x_ref[...], w_ref[...], preferred_element_type=jnp.float32)
        + b_ref[...]
    ).astype(out_ref.dtype)


def fuse_prediction_params(w_policy, b_policy, w_value, b_value):
    """Pack both heads into one lane-dense weight slab (done once, outside the hot loop).

    Returns (w_fused (D, P_pad), b_fused (1, P_pad), P) with the value column at
    index P and zero padding beyond; P_pad is a multiple of 128.
    """
    D, P = w_policy.shape
    P_pad = _round_up(P + 1, 128)
    w = jnp.zeros((D, P_pad), jnp.float32)
    w = w.at[:, :P].set(w_policy.astype(jnp.float32))
    w = w.at[:, P:P + 1].set(w_value.astype(jnp.float32))
    b = jnp.zeros((1, P_pad), jnp.float32)
    b = b.at[0, :P].set(b_policy.astype(jnp.float32))
    b = b.at[0, P].set(b_value.astype(jnp.float32)[0])
    return w, b, P


@functools.partial(jax.jit, static_argnums=(3,))
def muzero_prediction(x, w_fused, b_fused, num_policy):
    """x: (B, D); w_fused: (D, P_pad); b_fused: (1, P_pad).

    Returns (policy_logits (B, num_policy), value (B,)).
    """
    B, D = x.shape
    P_pad = w_fused.shape[1]

    # Batch tile: at least a full 8-sublane f32 tile; cap at 128 rows (one MXU
    # pass worth) for large batched MCTS-leaf evaluation.
    TB = 128 if B > 128 else _round_up(max(B, 1), 8)
    B_pad = _round_up(B, TB)
    if B_pad != B:
        # Tiny, fused under the same jit; keeps all kernel tiles fully valid.
        x = jnp.pad(x, ((0, B_pad - B), (0, 0)))
    x = x.astype(jnp.float32)

    grid = (B_pad // TB,)

    # Advisory only: weights are fetched once (constant index_map), so count
    # them a single time; activations/outputs stream per tile.
    cost = pl.CostEstimate(
        flops=2 * B_pad * D * P_pad,
        transcendentals=0,
        bytes_accessed=4 * (B_pad * D + D * P_pad + P_pad + B_pad * P_pad),
    )

    out = pl.pallas_call(
        _prediction_kernel,
        out_shape=jax.ShapeDtypeStruct((B_pad, P_pad), jnp.float32),
        grid=grid,
        in_specs=[
            # x tile marches over the batch axis and auto-pipelines.
            pl.BlockSpec((TB, D), lambda i: (i, 0)),
            # Fused weights/bias: constant block index -> resident in VMEM
            # across the whole grid (fetched once).
            pl.BlockSpec((D, P_pad), lambda i: (0, 0)),
            pl.BlockSpec((1, P_pad), lambda i: (0, 0)),
        ],
        out_specs=pl.BlockSpec((TB, P_pad), lambda i: (i, 0)),
        compiler_params=pltpu.CompilerParams(
            dimension_semantics=("parallel",),
        ),
        cost_estimate=cost,
    )(x, w_fused, b_fused)

    # TODO(synk): for board_size >= 8 or very large embed_dim, add an N-axis
    # grid (tn ~ 2048 lanes) + vmem_limit_bytes to stay inside v7x's 64 MiB
    # VMEM; unnecessary at these shapes (weight slab is D*P_pad*4 B = 48 KiB).
    policy_logits = out[:B, :num_policy]
    value = out[:B, num_policy]          # .squeeze(-1) from the PyTorch forward
    return policy_logits, value


if __name__ == "__main__":
    # Shapes implied by the module: embed_dim=32, board_size=4 -> P = 4**4 = 256.
    B, D, BOARD = 2, 32, 4
    P = BOARD ** 4

    key = jax.random.PRNGKey(0)
    kx, kwp, kbp, kwv, kbv = jax.random.split(key, 5)

    x = jax.random.normal(kx, (B, D), dtype=jnp.float32)
    # PyTorch Linear parameters, stored transposed as (in_features, out_features).
    w_policy = jax.random.normal(kwp, (D, P), dtype=jnp.float32) * 0.02
    b_policy = jax.random.normal(kbp, (P,), dtype=jnp.float32) * 0.02
    w_value = jax.random.normal(kwv, (D, 1), dtype=jnp.float32) * 0.02
    b_value = jax.random.normal(kbv, (1,), dtype=jnp.float32) * 0.02

    # One-time parameter fusion (model-init-time work in real usage).
    w_fused, b_fused, num_policy = fuse_prediction_params(
        w_policy, b_policy, w_value, b_value)

    policy_logits, value = muzero_prediction(x, w_fused, b_fused, num_policy)
    jax.block_until_ready((policy_logits, value))

    # Reference check against plain JAX (same math as the nn.Linear forwards).
    ref_policy = x @ w_policy + b_policy
    ref_value = (x @ w_value + b_value)[:, 0]
    assert policy_logits.shape == (B, P)
    assert value.shape == (B,)
    assert jnp.allclose(policy_logits, ref_policy, atol=1e-5, rtol=1e-5)
    assert jnp.allclose(value, ref_value, atol=1e-5, rtol=1e-5)

    print("KERNEL_OK")
</pallas_src>

<mosaic_0001>
module attributes {stable_mosaic.version = 11 : i64} {
  func.func @_prediction_kernel(%arg0: i32, %arg1: memref<8x32xf32, #tpu.memory_space<vmem>>, %arg2: memref<32x384xf32, #tpu.memory_space<vmem>>, %arg3: memref<1x384xf32, #tpu.memory_space<vmem>>, %arg4: memref<8x384xf32, #tpu.memory_space<vmem>>) attributes {dimension_semantics = [#tpu.dimension_semantics<parallel>], iteration_bounds = array<i64: 1>, scalar_prefetch = 0 : i64, scratch_operands = 0 : i64, tpu.core_type = #tpu.core_type<tc>, window_params = [{transform_indices = @transform_0, window_bounds = array<i64: 8, 32>}, {pipeline_mode = #tpu.pipeline_mode<synchronous>, transform_indices = @transform_1, window_bounds = array<i64: 32, 384>}, {pipeline_mode = #tpu.pipeline_mode<synchronous>, transform_indices = @transform_2, window_bounds = array<i64: 1, 384>}, {transform_indices = @transform_3, window_bounds = array<i64: 8, 384>}]} {
    %c0 = arith.constant 0 : index
    %c0_0 = arith.constant 0 : index
    %0 = vector.load %arg1[%c0, %c0_0] : memref<8x32xf32, #tpu.memory_space<vmem>>, vector<8x32xf32>
    %c0_1 = arith.constant 0 : index
    %c0_2 = arith.constant 0 : index
    %1 = vector.load %arg2[%c0_1, %c0_2] : memref<32x384xf32, #tpu.memory_space<vmem>>, vector<32x384xf32>
    %cst = arith.constant dense<0.000000e+00> : vector<8x384xf32>
    %2 = tpu.matmul %0, %1, %cst {dimension_numbers = #tpu.dot_dimension_numbers<[1], [0], [0], [1], [0, 0, 1, 1], [], []>} : vector<8x32xf32>, vector<32x384xf32>, vector<8x384xf32> -> vector<8x384xf32>
    %c0_3 = arith.constant 0 : index
    %c0_4 = arith.constant 0 : index
    %3 = vector.load %arg3[%c0_3, %c0_4] : memref<1x384xf32, #tpu.memory_space<vmem>>, vector<1x384xf32>
    %4 = vector.broadcast %3 : vector<1x384xf32> to vector<8x384xf32>
    %5 = arith.addf %2, %4 : vector<8x384xf32>
    %c0_5 = arith.constant 0 : index
    %c0_6 = arith.constant 0 : index
    %6 = vector.load %arg4[%c0_5, %c0_6] : memref<8x384xf32, #tpu.memory_space<vmem>>, vector<8x384xf32>
    tpu.vector_store %arg4[%c0_5, %c0_6], %5 {strides = array<i32>} : memref<8x384xf32, #tpu.memory_space<vmem>>, vector<8x384xf32>,
    return
  }
  func.func @transform_0(%arg0: i32) -> (i32, i32) {
    %c0_i32 = arith.constant 0 : i32
    %c0_i32_0 = arith.constant 0 : i32
    return %arg0, %c0_i32 : i32, i32
  }
  func.func @transform_1(%arg0: i32) -> (i32, i32) {
    %c0_i32 = arith.constant 0 : i32
    %c0_i32_0 = arith.constant 0 : i32
    %c0_i32_1 = arith.constant 0 : i32
    return %c0_i32, %c0_i32_0 : i32, i32
  }
  func.func @transform_2(%arg0: i32) -> (i32, i32) {
    %c0_i32 = arith.constant 0 : i32
    %c0_i32_0 = arith.constant 0 : i32
    %c0_i32_1 = arith.constant 0 : i32
    return %c0_i32, %c0_i32_0 : i32, i32
  }
  func.func @transform_3(%arg0: i32) -> (i32, i32) {
    %c0_i32 = arith.constant 0 : i32
    %c0_i32_0 = arith.constant 0 : i32
    return %arg0, %c0_i32 : i32, i32
  }
}

</mosaic_0001>

<bundles_post_ra>
// kernel: muzero_prediction.1
= control target key start
LH: loop header
LB: loop body
LE: loop exit
PB: predicated region body
PF: predicated region fallthrough
CT: control target
= control target key end

     0   :  { %8 = vsyncpa [#allocation3], 0  ;;  %s155_s15 = smov [#allocation2]   ;;  %s156_s17 = smov 384   ;;  %s196_s0 = inlined_call_operand.vmem [shape: f32[8,32], index: 0, kind: input, shape index: {}]   ;;  %s197_s1 = inlined_call_operand.hbm [shape: f32[32,384], index: 1, kind: input, shape index: {}]   ;;  %s198_s2 = inlined_call_operand.vmem [shape: f32[1,384], index: 2, kind: input, shape index: {}]   ;;  %s199_s3 = inlined_call_operand.vmem [shape: f32[8,384], index: 3, kind: output, shape index: {}]  }
   0x1   :  { %s15_s14 = sshll.u32 %s197_s1, 4  ;;  %s17_s16 = sshll.u32 %s155_s15, 4  ;;  %s16_s14 = int_to_ptr.hbm [resolvable:$true] %s15_s14  ;;  %s18_s16 = int_to_ptr.vmem [resolvable:$true] %s17_s16 }
   0x2   :  { %s157_s18 = smov 24  }
   0x3   :  { %23 = dma.hbm_to_vmem [thread:$0]  %s16_s14, 1536, %s18_s16, [#allocation3], %s156_s17, %s156_s17, %s157_s18  }
   0x4   :  { %153 = dma.done.wait [#allocation3], 1536  }
   0x5   :  { %154 = vsyncadd [#allocation3], 4294965760  ;;  %v42_v0 = vld [vmem:[#allocation2 + $0x58] sm:$0xff]  ;;  %v39_v1 = vld [vmem:[#allocation2 + $0x40] sm:$0xff]  ;;  %vm51_vm0 = vcmask 261120  }
   0x6   :  { %107 = vmatpush.msra.mxu2 %v42_v0  ;;  %v40_v2 = vld [vmem:[#allocation2 + $0x48] sm:$0xff]  ;;  %v41_v3 = vld [vmem:[#allocation2 + $0x50] sm:$0xff]  ;;  %v38_v6 = vld [vmem:[#allocation2 + $0x38] sm:$0xff] }
   0x7   :  { %v36_v4 = vld [vmem:[#allocation2 + $0x28] sm:$0xff]  ;;  %67 = vmatpush.msra.mxu0 %v40_v2  ;;  %87 = vmatpush.msra.mxu1 %v41_v3  ;;  %v37_v5 = vld [vmem:[#allocation2 + $0x30] sm:$0xff]  ;;  %v34_v7 = vld [vmem:[#allocation2 + $0x18] sm:$0xff] }
   0x8   :  { %108 = vmatpush.msra.mxu2 %v39_v1  ;;  %v35_v8 = vld [vmem:[#allocation2 + $0x20] sm:$0xff]  ;;  %v33_v9 = vld [vmem:[#allocation2 + $0x10] sm:$0xff]  ;;  %v32_v12 = vld [vmem:[#allocation2 + $0x8] sm:$0xff] }
   0x9   :  { %68 = vmatpush.msra.mxu0 %v37_v5  ;;  %88 = vmatpush.msra.mxu1 %v38_v6  ;;  %v30_v10 = vld [vmem:[%s196_s0] sm:$0xff] }
   0xa   :  { %109 = vmatpush.msra.mxu2 %v36_v4  ;;  %v31_v11 = vld [vmem:[#allocation2] sm:$0xff] }
   0xb   :  { %69 = vmatpush.msra.mxu0 %v34_v7  ;;  %89 = vmatpush.msra.mxu1 %v35_v8  ;;  %v43_v13 = vld [vmem:[%s198_s2] sm:$0x7] }
   0xc   :  { %110 = vmatpush.msra.mxu2 %v33_v9  ;;  %v45_v14 = vperm.slane %v43_v13, 0  ;;  %v46_v15 = vperm.slane %v43_v13, 1  ;;  %v47_v20 = vperm.slane %v43_v13, 2 }
   0xd   :  { %125 = vmatmul.msk.f32.vlgmr.msra.gmra.mxu2 %vm51_vm0, %v30_v10  ;;  %70 = vmatpush.msra.mxu0 %v31_v11 }
   0xe   :  { %90 = vmatpush.msra.mxu1 %v32_v12  ;;  %123 = vmatmul.msk.f32.vlgmr.msra.gmra.mxu0 %vm51_vm0, %v30_v10 }
   0xf   :  { %124 = vmatmul.msk.f32.vlgmr.msra.gmra.mxu1 %vm51_vm0, %v30_v10 }
  0x8b   :  { %v72_v16 = vpop.f32.mrf.mxu0 }
  0x8c   :  { %v73_v17 = vadd.f32 %v72_v16, %v45_v14  ;;  %v92_v18 = vpop.f32.mrf.mxu1 }
  0x8d   :  { %v93_v19 = vadd.f32 %v92_v18, %v46_v15 }
  0x8e   :  { %115 = vst [vmem:[%s199_s3] sm:$0xff] %v73_v17 }
  0x8f   :  { %116 = vst [vmem:[%s199_s3 + $0x8] sm:$0xff] %v93_v19 }
  0x90   :  { %v112_v21 = vpop.f32.mrf.mxu2 }
  0x91   :  { %v113_v22 = vadd.f32 %v112_v21, %v47_v20 }
  0x93   :  { %117 = vst [vmem:[%s199_s3 + $0x10] sm:$0xff] %v113_v22 }
  0x94   :  { %122 = vsyncpa [#allocation3], 1 }

</bundles_post_ra>
